<compile_context>
chip_gen: v6e
topology: v6e:2x2x1
jax: 0.10.0
libtpu: 0.0.40
codegen_flags: <defaults>
</compile_context>

<pallas_src>
import jax
import jax.numpy as jnp
from jax.experimental import pallas as pl
from jax.experimental.pallas import tpu as pltpu


def _mlp_critic_kernel(s_ref, a_ref, w1s_ref, w1a_ref, b1_ref, w2_ref, b2_ref,
                       w3_ref, b3_ref, o_ref):
    """Fused  out = fc3(relu(fc2(relu(fc1(cat[s, a])))))  on one batch tile.

    Output is produced lane-dense as (1, tb): batch on the 128-lane axis.
    """
    # Contract the feature (last) dims of both operands == x @ W.T with W kept in
    # PyTorch (out_features, in_features) layout.
    dn = (((1,), (1,)), ((), ()))

    s = s_ref[...]                        # (tb, dimState)        f32
    a = a_ref[...]                        # (tb, dimAction)       f32

    # fc1: torch.cat folded via pre-split weights (both operands tile-aligned).
    h = jax.lax.dot_general(s, w1s_ref[...], dn,
                            preferred_element_type=jnp.float32)
    h += jax.lax.dot_general(a, w1a_ref[...], dn,
                             preferred_element_type=jnp.float32)
    h = jnp.maximum(h + b1_ref[...], 0.0)                  # (tb, hidden), VPU ReLU

    # fc2
    h = jax.lax.dot_general(h, w2_ref[...], dn, preferred_element_type=jnp.float32)
    h = jnp.maximum(h + b2_ref[...], 0.0)                  # (tb, hidden)

    # fc3 lane-dense: (1, hidden) x (tb, hidden) -> (1, tb); batch on lanes.
    y = jax.lax.dot_general(w3_ref[...], h, dn, preferred_element_type=jnp.float32)
    o_ref[...] = (y + b3_ref[0, 0]).astype(o_ref.dtype)    # scalar bias from SMEM


def mlp_critic_forward(state, action, w1, b1, w2, b2, w3, b3, *, block_batch=1024):
    """Pallas MLPCritic.forward.

    Args (all float32):
      state:  (batch, dimState)
      action: (batch, dimAction)
      w1: (hidden, dimState+dimAction)   b1: (1, hidden)     # PyTorch fc1.weight layout
      w2: (hidden, hidden)               b2: (1, hidden)
      w3: (1, hidden)                    b3: (1, 1)
    Returns:
      (batch, 1)
    """
    batch, dim_state = state.shape
    _, dim_action = action.shape
    hidden, din = w1.shape
    assert din == dim_state + dim_action
    assert w2.shape == (hidden, hidden) and w3.shape == (1, hidden)
    assert b1.shape == (1, hidden) and b2.shape == (1, hidden) and b3.shape == (1, 1)

    # One-time tiny slices in the wrapper (NOT inside the traced kernel body):
    # keeps both fc1 operands lane-aligned, folds torch.cat with zero extra HBM.
    w1_s = w1[:, :dim_state]              # (hidden, dimState)
    w1_a = w1[:, dim_state:]              # (hidden, dimAction)

    # Lane-dense output layout: (1, batch); reshaped to (batch, 1) at the end
    # (free metadata reshape -- same contiguous element order).
    out_shape = jax.ShapeDtypeStruct((1, batch), state.dtype)

    cost = pl.CostEstimate(
        flops=2 * batch * (din * hidden + hidden * hidden + hidden),
        transcendentals=0,
        bytes_accessed=4 * (batch * (din + 1) + hidden * (din + hidden + 3) + 1),
    )

    smem = pl.BlockSpec(memory_space=pltpu.MemorySpace.SMEM)   # b3 scalar
    vmem = pl.BlockSpec(memory_space=pltpu.MemorySpace.VMEM)

    if batch <= 256:
        # Tiny problem: skip grid/pipeline machinery, whole arrays in VMEM.
        out = pl.pallas_call(
            _mlp_critic_kernel,
            out_shape=out_shape,
            in_specs=[vmem] * 8 + [smem],
            out_specs=vmem,
            cost_estimate=cost,
        )(state, action, w1_s, w1_a, b1, w2, b2, w3, b3)
        return out.reshape(batch, 1)

    # Large batch: stream activation tiles over a 1-D batch grid.  Weights/biases
    # use constant index maps so they stay VMEM-resident (one DMA each).
    # Keep at least two grid steps so v7x's two TensorCores can split the grid;
    # cap the tile at block_batch (rounded to a multiple of 8).
    tb = min(int(block_batch), max(8, 8 * pl.cdiv(pl.cdiv(batch, 2), 8)))
    grid = (pl.cdiv(batch, tb),)

    out = pl.pallas_call(
        _mlp_critic_kernel,
        out_shape=out_shape,
        grid=grid,
        in_specs=[
            pl.BlockSpec((tb, dim_state), lambda i: (i, 0)),      # state tile
            pl.BlockSpec((tb, dim_action), lambda i: (i, 0)),     # action tile
            pl.BlockSpec((hidden, dim_state), lambda i: (0, 0)),  # W1[:, :dS] (resident)
            pl.BlockSpec((hidden, dim_action), lambda i: (0, 0)), # W1[:, dS:] (resident)
            pl.BlockSpec((1, hidden), lambda i: (0, 0)),          # b1
            pl.BlockSpec((hidden, hidden), lambda i: (0, 0)),     # W2
            pl.BlockSpec((1, hidden), lambda i: (0, 0)),          # b2
            pl.BlockSpec((1, hidden), lambda i: (0, 0)),          # W3
            smem,                                                 # b3 scalar in SMEM
        ],
        out_specs=pl.BlockSpec((1, tb), lambda i: (0, i)),        # lane-dense output
        compiler_params=pltpu.CompilerParams(
            # Independent batch tiles -> v7x's 2 TensorCores split the grid;
            # harmless no-op on single-TC v5e/v6e.
            dimension_semantics=("parallel",),
        ),
        cost_estimate=cost,
    )(state, action, w1_s, w1_a, b1, w2, b2, w3, b3)
    return out.reshape(batch, 1)


if __name__ == "__main__":
    dim_state, dim_action, hidden = 32, 8, 32
    din = dim_state + dim_action

    key = jax.random.PRNGKey(0)
    ks, ka, k1, kb1, k2, kb2, k3, kb3, ks2, ka2 = jax.random.split(key, 10)

    def linear_init(kw, kb, out_f, in_f):
        # nn.Linear default init: U(-1/sqrt(fan_in), 1/sqrt(fan_in)).
        bound = 1.0 / (in_f ** 0.5)
        w = jax.random.uniform(kw, (out_f, in_f), jnp.float32, -bound, bound)
        b = jax.random.uniform(kb, (1, out_f), jnp.float32, -bound, bound)
        return w, b

    w1, b1 = linear_init(k1, kb1, hidden, din)
    w2, b2 = linear_init(k2, kb2, hidden, hidden)
    w3, b3 = linear_init(k3, kb3, 1, hidden)

    def ref_forward(s, a):
        x = jnp.concatenate([s, a], axis=1)
        h = jax.nn.relu(jnp.dot(x, w1.T, precision="highest") + b1)
        h = jax.nn.relu(jnp.dot(h, w2.T, precision="highest") + b2)
        return jnp.dot(h, w3.T, precision="highest") + b3

    # --- small batch: single-invocation (no-grid) path ------------------------
    batch = 8
    state = jax.random.normal(ks, (batch, dim_state), jnp.float32)
    action = jax.random.normal(ka, (batch, dim_action), jnp.float32)
    out = jax.block_until_ready(
        mlp_critic_forward(state, action, w1, b1, w2, b2, w3, b3))
    ref = ref_forward(state, action)
    assert out.shape == (batch, 1)
    assert jnp.allclose(out, ref, atol=2e-3, rtol=2e-3), "small-batch mismatch"

    # --- large batch: batch-tiled, lane-dense, megacore-parallel path ----------
    big = 512
    state_b = jax.random.normal(ks2, (big, dim_state), jnp.float32)
    action_b = jax.random.normal(ka2, (big, dim_action), jnp.float32)
    out_b = jax.block_until_ready(
        mlp_critic_forward(state_b, action_b, w1, b1, w2, b2, w3, b3))
    ref_b = ref_forward(state_b, action_b)
    assert out_b.shape == (big, 1)
    assert jnp.allclose(out_b, ref_b, atol=2e-3, rtol=2e-3), "tiled-batch mismatch"

    print("KERNEL_OK")
</pallas_src>

<mosaic_0001>
module attributes {stable_mosaic.version = 11 : i64} {
  func.func @_mlp_critic_kernel(%arg0: memref<8x32xf32, #tpu.memory_space<vmem>>, %arg1: memref<8x8xf32, #tpu.memory_space<vmem>>, %arg2: memref<32x32xf32, #tpu.memory_space<vmem>>, %arg3: memref<32x8xf32, #tpu.memory_space<vmem>>, %arg4: memref<1x32xf32, #tpu.memory_space<vmem>>, %arg5: memref<32x32xf32, #tpu.memory_space<vmem>>, %arg6: memref<1x32xf32, #tpu.memory_space<vmem>>, %arg7: memref<1x32xf32, #tpu.memory_space<vmem>>, %arg8: memref<1x1xf32, #tpu.memory_space<smem>>, %arg9: memref<1x8xf32, #tpu.memory_space<vmem>>) attributes {dimension_semantics = [], scalar_prefetch = 0 : i64, scratch_operands = 0 : i64, tpu.core_type = #tpu.core_type<tc>} {
    %c0 = arith.constant 0 : index
    %c0_0 = arith.constant 0 : index
    %0 = vector.load %arg0[%c0, %c0_0] : memref<8x32xf32, #tpu.memory_space<vmem>>, vector<8x32xf32>
    %c0_1 = arith.constant 0 : index
    %c0_2 = arith.constant 0 : index
    %1 = vector.load %arg1[%c0_1, %c0_2] : memref<8x8xf32, #tpu.memory_space<vmem>>, vector<8x8xf32>
    %c0_3 = arith.constant 0 : index
    %c0_4 = arith.constant 0 : index
    %2 = vector.load %arg2[%c0_3, %c0_4] : memref<32x32xf32, #tpu.memory_space<vmem>>, vector<32x32xf32>
    %cst = arith.constant dense<0.000000e+00> : vector<8x32xf32>
    %3 = tpu.matmul %0, %2, %cst {dimension_numbers = #tpu.dot_dimension_numbers<[1], [1], [0], [0], [0, 0, 1, 0], [], []>} : vector<8x32xf32>, vector<32x32xf32>, vector<8x32xf32> -> vector<8x32xf32>
    %c0_5 = arith.constant 0 : index
    %c0_6 = arith.constant 0 : index
    %4 = vector.load %arg3[%c0_5, %c0_6] : memref<32x8xf32, #tpu.memory_space<vmem>>, vector<32x8xf32>
    %cst_7 = arith.constant dense<0.000000e+00> : vector<8x32xf32>
    %5 = tpu.matmul %1, %4, %cst_7 {dimension_numbers = #tpu.dot_dimension_numbers<[1], [1], [0], [0], [0, 0, 1, 0], [], []>} : vector<8x8xf32>, vector<32x8xf32>, vector<8x32xf32> -> vector<8x32xf32>
    %6 = arith.addf %3, %5 : vector<8x32xf32>
    %c0_8 = arith.constant 0 : index
    %c0_9 = arith.constant 0 : index
    %7 = vector.load %arg4[%c0_8, %c0_9] : memref<1x32xf32, #tpu.memory_space<vmem>>, vector<1x32xf32>
    %8 = vector.broadcast %7 : vector<1x32xf32> to vector<8x32xf32>
    %9 = arith.addf %6, %8 : vector<8x32xf32>
    %cst_10 = arith.constant 0.000000e+00 : f32
    %10 = vector.broadcast %cst_10 : f32 to vector<8x32xf32>
    %11 = arith.maximumf %9, %10 : vector<8x32xf32>
    %c0_11 = arith.constant 0 : index
    %c0_12 = arith.constant 0 : index
    %12 = vector.load %arg5[%c0_11, %c0_12] : memref<32x32xf32, #tpu.memory_space<vmem>>, vector<32x32xf32>
    %cst_13 = arith.constant dense<0.000000e+00> : vector<8x32xf32>
    %13 = tpu.matmul %11, %12, %cst_13 {dimension_numbers = #tpu.dot_dimension_numbers<[1], [1], [0], [0], [0, 0, 1, 0], [], []>} : vector<8x32xf32>, vector<32x32xf32>, vector<8x32xf32> -> vector<8x32xf32>
    %c0_14 = arith.constant 0 : index
    %c0_15 = arith.constant 0 : index
    %14 = vector.load %arg6[%c0_14, %c0_15] : memref<1x32xf32, #tpu.memory_space<vmem>>, vector<1x32xf32>
    %15 = vector.broadcast %14 : vector<1x32xf32> to vector<8x32xf32>
    %16 = arith.addf %13, %15 : vector<8x32xf32>
    %cst_16 = arith.constant 0.000000e+00 : f32
    %17 = vector.broadcast %cst_16 : f32 to vector<8x32xf32>
    %18 = arith.maximumf %16, %17 : vector<8x32xf32>
    %c0_17 = arith.constant 0 : index
    %c0_18 = arith.constant 0 : index
    %19 = vector.load %arg7[%c0_17, %c0_18] : memref<1x32xf32, #tpu.memory_space<vmem>>, vector<1x32xf32>
    %cst_19 = arith.constant dense<0.000000e+00> : vector<1x8xf32>
    %20 = tpu.matmul %19, %18, %cst_19 {dimension_numbers = #tpu.dot_dimension_numbers<[1], [1], [0], [0], [0, 0, 1, 0], [], []>} : vector<1x32xf32>, vector<8x32xf32>, vector<1x8xf32> -> vector<1x8xf32>
    %c0_20 = arith.constant 0 : index
    %c0_21 = arith.constant 0 : index
    %21 = memref.load %arg8[%c0_20, %c0_21] : memref<1x1xf32, #tpu.memory_space<smem>>
    %22 = vector.broadcast %21 : f32 to vector<1x8xf32>
    %23 = arith.addf %20, %22 : vector<1x8xf32>
    %c0_22 = arith.constant 0 : index
    %c0_23 = arith.constant 0 : index
    %24 = vector.load %arg9[%c0_22, %c0_23] : memref<1x8xf32, #tpu.memory_space<vmem>>, vector<1x8xf32>
    tpu.vector_store %arg9[%c0_22, %c0_23], %23 {strides = array<i32>} : memref<1x8xf32, #tpu.memory_space<vmem>>, vector<1x8xf32>,
    return
  }
}

</mosaic_0001>

<bundles_post_ra>
// kernel: tpu_custom_call.1
= control target key start
LH: loop header
LB: loop body
LE: loop exit
PB: predicated region body
PF: predicated region fallthrough
CT: control target
= control target key end

     0   :  { %15 = vsyncpa [#allocation4], 0  ;;  %s718_s0 = inlined_call_operand.vmem [shape: f32[8,32], index: 0, kind: input, shape index: {}]   ;;  %s719_s1 = inlined_call_operand.hbm [shape: f32[8,8], index: 1, kind: input, shape index: {}]   ;;  %s720_s2 = inlined_call_operand.vmem [shape: f32[32,32], index: 2, kind: input, shape index: {}]   ;;  %s721_s3 = inlined_call_operand.vmem [shape: f32[32,8], index: 3, kind: input, shape index: {}]   ;;  %s722_s4 = inlined_call_operand.vmem [shape: f32[1,32], index: 4, kind: input, shape index: {}]   ;;  %s723_s5 = inlined_call_operand.hbm [shape: f32[32,32], index: 5, kind: input, shape index: {}]   ;;  %s724_s6 = inlined_call_operand.vmem [shape: f32[1,32], index: 6, kind: input, shape index: {}]   ;;  %s725_s7 = inlined_call_operand.vmem [shape: f32[1,32], index: 7, kind: input, shape index: {}]   ;;  %s726_s8 = inlined_call_operand.<no memory space> [shape: f32[1,1], index: 8, kind: input, shape index: {}]   ;;  %s727_s9 = inlined_call_operand.hbm [shape: f32[1,8], index: 9, kind: output, shape index: {}]  }
   0x1   :  { %16 = vsyncpa [#allocation7], 0 }
   0x2   :  { %17 = vsyncpa [#allocation5], 0  ;;  %s592_s30 = smov [#allocation3]   ;;  %s593_s11 = smov [#allocation6]  }
   0x3   :  { %s26_s10 = sshll.u32 %s592_s30, 4  ;;  %s41_s12 = sshll.u32 %s593_s11, 4  ;;  %s27_s10 = int_to_ptr.vmem [resolvable:$true] %s26_s10  ;;  %s42_s12 = int_to_ptr.vmem [resolvable:$true] %s41_s12 }
   0x4   :  { %s534_s13 = scalar_lea.vmem %s27_s10, 128  ;;  %p539_p1 = scmp.lt.s32.totalorder %s27_s10, %s27_s10 }
   0x5   :  { %p535_p0 = scmp.ne.s32.totalorder %s27_s10, %s534_s13  ;;  %p540_p2 = scmp.lt.s32.totalorder %s534_s13, %s534_s13 }
   0x7   :  { %p541_p3 = por %p540_p2, %p539_p1 }
   0x9   :  { %p542_p4 = pnand %p541_p3, %p535_p0 }
   0xb   :  { %545 = shalt.err (!%p542_p4)
}
   0xc   :  { %29 = dma.hbm_to_vmem [thread:$0]  %s719_s1, 128, %s27_s10, [#allocation4]  }
   0xd   :  { %s554_s16 = scalar_lea.vmem %s42_s12, 512  ;;  %p559_p6 = scmp.lt.s32.totalorder %s42_s12, %s42_s12 }
   0xe   :  { %p555_p5 = scmp.ne.s32.totalorder %s42_s12, %s554_s16  ;;  %p560_p7 = scmp.lt.s32.totalorder %s554_s16, %s554_s16 }
  0x10   :  { %p561_p8 = por %p560_p7, %p559_p6 }
  0x12   :  { %p562_p9 = pnand %p561_p8, %p555_p5 }
  0x14   :  { %565 = shalt.err (!%p562_p9)
}
  0x15   :  { %s594_s17 = smov 128   ;;  %s595_s18 = smov 8  }
  0x16   :  { %47 = dma.hbm_to_vmem [thread:$0]  %s723_s5, 512, %s42_s12, [#allocation7], %s594_s17, %s594_s17, %s595_s18  }
  0x17   :  { %586 = dma.done.wait [#allocation4], 128  }
  0x18   :  { %587 = vsyncadd [#allocation4], 4294967168 }
  0x19   :  { %588 = dma.done.wait [#allocation7], 512  }
  0x1a   :  { %589 = vsyncadd [#allocation7], 4294966784  ;;  %v596_v0 = vmov 0.0   ;;  %vm597_vm0 = vmmov 0   ;;  %vm70_vm1 = vcmask 64512   ;;  %vm156_vm2 = vcmask 261120  }
  0x1b   :  { %481 = vmatprep.subr.mxu0 %v596_v0  ;;  %492 = vmatprep.subr.mxu1 %v596_v0  ;;  %v69_v1 = vld [vmem:[%s721_s3 + $0x18] sm:$0xff]  ;;  %v68_v3 = vld [vmem:[%s721_s3 + $0x10] sm:$0xff]  ;;  %v67_v5 = vld [vmem:[%s721_s3 + $0x8] sm:$0xff]  ;;  %v350_v29 = vstv %s726_s8  ;;  %s598_s20 = smov [#allocation8]   ;;  %vm427_vm3 = vcmask 57344  }
  0x1c   :  { %489 = vmatprep.mubr.msk.f32.mxu0 %vm597_vm0, %v596_v0  ;;  %500 = vmatprep.mubr.msk.f32.mxu1 %vm597_vm0, %v596_v0  ;;  %v65_v2 = vld [vmem:[%s720_s2 + $0x18] sm:$0xff]  ;;  %v64_v4 = vld [vmem:[%s720_s2 + $0x10] sm:$0xff]  ;;  %v63_v6 = vld [vmem:[%s720_s2 + $0x8] sm:$0xff]  ;;  %s435_s1 = sshll.u32 %s598_s20, 4  ;;  %s436_s1 = int_to_ptr.vmem [resolvable:$true] %s435_s1 }
  0x1d   :  { %482 = vmatpush3.xpose.msk.msra.mxu0 %vm70_vm1, %v69_v1  ;;  %493 = vmatpush3.xpose.msk.msra.mxu1 %vm156_vm2, %v65_v2  ;;  %v66_v7 = vld [vmem:[%s721_s3] sm:$0xff]  ;;  %v253_v12 = vld [vmem:[#allocation6 + $0x10] sm:$0xff]  ;;  %v252_v13 = vld [vmem:[#allocation6 + $0x8] sm:$0xff]  ;;  %s570_s21 = scalar_lea.vmem %s436_s1, 32  ;;  %p571_p11 = scmp.lt.s32.totalorder %s436_s1, %s436_s1 }
  0x1e   :  { %483 = vmatprep.subr.mxu0 %v596_v0  ;;  %494 = vmatprep.subr.mxu1 %v596_v0  ;;  %v62_v8 = vld [vmem:[%s720_s2] sm:$0xff]  ;;  %v251_v14 = vld [vmem:[#allocation6] sm:$0xff] }
  0x1f   :  { %v61_v9 = vld [vmem:[#allocation3] sm:$0xff] }
  0x20   :  { %v60_v10 = vld [vmem:[%s718_s0] sm:$0xff] }
  0x21   :  { %484 = vmatpush3.xpose.msk.msra.mxu0 %vm70_vm1, %v68_v3  ;;  %495 = vmatpush3.xpose.msk.msra.mxu1 %vm156_vm2, %v64_v4  ;;  %v254_v11 = vld [vmem:[#allocation6 + $0x18] sm:$0xff] }
  0x22   :  { %485 = vmatprep.subr.mxu0 %v596_v0  ;;  %496 = vmatprep.subr.mxu1 %v596_v0  ;;  %v455_v17 = vld [vmem:[%s722_s4] ss:$0 sm:$0xff] }
  0x23   :  { %v456_v23 = vld [vmem:[%s724_s6] ss:$0 sm:$0xff]  ;;  %s566_s6 = scalar_lea.vmem %s436_s1, 16 }
  0x24   :  { %v348_v28 = vld [vmem:[%s725_s7] sm:$0x1]  ;;  %p567_p10 = scmp.ne.s32.totalorder %s436_s1, %s566_s6  ;;  %p572_p12 = scmp.lt.s32.totalorder %s570_s21, %s566_s6 }
  0x25   :  { %486 = vmatpush3.xpose.msk.msra.mxu0 %vm70_vm1, %v67_v5  ;;  %497 = vmatpush3.xpose.msk.msra.mxu1 %vm156_vm2, %v63_v6 }
  0x26   :  { %487 = vmatprep.subr.mxu0 %v596_v0  ;;  %498 = vmatprep.subr.mxu1 %v596_v0  ;;  %p573_p13 = por %p572_p12, %p571_p11 }
  0x28   :  { %p574_p0 = pnand %p573_p13, %p567_p10 }
  0x29   :  { %488 = vmatpush3.xpose.msk.msra.mxu0 %vm70_vm1, %v66_v7  ;;  %499 = vmatpush3.xpose.msk.msra.mxu1 %vm156_vm2, %v62_v8 }
  0x2a   :  { %503 = vmatprep.subr.mxu0 %v596_v0  ;;  %514 = vmatprep.subr.mxu1 %v596_v0 }
  0x2c   :  { %490 = vmatmul.mubr.msk.f32.vlgmr.msra.gmra.mxu0 %vm70_vm1, %v61_v9  ;;  %501 = vmatmul.mubr.msk.f32.vlgmr.msra.gmra.mxu1 %vm156_vm2, %v60_v10 }
  0x2d   :  { %504 = vmatpush3.xpose.msk.msra.mxu0 %vm156_vm2, %v254_v11  ;;  %511 = vmatprep.mubr.msk.f32.mxu0 %vm597_vm0, %v596_v0 }
  0x2e   :  { %505 = vmatprep.subr.mxu0 %v596_v0  ;;  %516 = vmatprep.mubr.msk.f32.mxu1 %vm597_vm0, %v596_v0 }
  0x31   :  { %506 = vmatpush3.xpose.msk.msra.mxu0 %vm156_vm2, %v253_v12 }
  0x32   :  { %507 = vmatprep.subr.mxu0 %v596_v0 }
  0x35   :  { %508 = vmatpush3.xpose.msk.msra.mxu0 %vm156_vm2, %v252_v13 }
  0x36   :  { %509 = vmatprep.subr.mxu0 %v596_v0 }
  0x39   :  { %510 = vmatpush3.xpose.msk.msra.mxu0 %vm156_vm2, %v251_v14 }
  0xec   :  { %v152_v15 = vpop.f32.mrf.mxu0  ;;  %v238_v16 = vpop.f32.mrf.mxu1 }
  0xed   :  { %v239_v18 = vadd.f32 %v238_v16, %v152_v15 }
  0xee   :  { %v491_v19 = vpop.f32.mrf.mxu0  ;;  %v502_v20 = vpop.f32.mrf.mxu1 }
  0xef   :  { %v249_v21 = vadd.f32 %v455_v17, %v239_v18 }
  0xf1   :  { %v250_v22 = vmax.f32 %v249_v21, 0.0 }
  0xf3   :  { %512 = vmatmul.mubr.msk.f32.vlgmr.msra.gmra.mxu0 %vm156_vm2, %v250_v22 }
 0x1b3   :  { %v343_v24 = vpop.f32.mrf.mxu0 }
 0x1b4   :  { %v344_v25 = vadd.f32 %v456_v23, %v343_v24 }
 0x1b5   :  { %v513_v26 = vpop.f32.mrf.mxu0 }
 0x1b6   :  { %v347_v27 = vmax.f32 %v344_v25, 0.0 }
 0x1b8   :  { %515 = vmatpush3.xpose.msk.msra.mxu1 %vm156_vm2, %v347_v27 }
 0x1bb   :  { %517 = vmatmul.mubr.msk.f32.vlgmr.msra.gmra.mxu1 %vm156_vm2, %v348_v28 }
 0x27b   :  { %v423_v30 = vpop.f32.mrf.mxu1 }
 0x27c   :  { %v424_v31 = vadd.f32 %v423_v30, %v350_v29 }
 0x27d   :  { %v518_v32 = vpop.f32.mrf.mxu1 }
 0x27e   :  { %428 = vst.msk [vmem:[#allocation8] sm:$0x1] %vm427_vm3, %v424_v31 }
 0x27f   :  { %577 = shalt.err (!%p574_p0)
}
 0x280   :  { %438 = dma.vmem_to_hbm [thread:$0]  %s436_s1, 16, %s727_s9, [#allocation5]  }
 0x281   :  { %590 = dma.done.wait [#allocation5], 16  }
 0x282   :  { %591 = vsyncadd [#allocation5], 4294967280 }
 0x283   :  { %442 = vsyncpa [#allocation4], 1 }
 0x284   :  { %443 = vsyncpa [#allocation7], 1 }
 0x285   :  { %444 = vsyncpa [#allocation5], 1 }

</bundles_post_ra>
